<compile_context>
chip_gen: v7x
topology: tpu7x:2x2x1
jax: 0.10.0
libtpu: 0.0.40
codegen_flags: <defaults>
</compile_context>

<pallas_src>
import jax
import jax.numpy as jnp
from jax import lax
from jax.experimental import pallas as pl
from jax.experimental.pallas import tpu as pltpu

_MASK_FILL = -1.0e6


def attention_kernel(lens_ref, dec_ref, ctx_ref,
                     w_in_t_ref, w_out_ctx_t_ref, w_out_dec_t_ref, b_out_ref,
                     out_ref, attn_ref):
    """One grid step == one tile of Bt batch elements.

    lens_ref        : (B,)          int32 src lengths (SMEM, scalar-prefetched)
    dec_ref         : (Bt, Lq, D)   decoder outputs ("output" in the module), f32
    ctx_ref         : (Bt, Lk, E2)  encoder context, f32
    w_in_t_ref      : (E2, D)       linear_in.weight.T            (bf16, shared)
    w_out_ctx_t_ref : (E2, D)       linear_out.weight[:, :E2].T   (bf16, shared)
    w_out_dec_t_ref : (D,  D)       linear_out.weight[:, E2:].T   (bf16, shared)
    b_out_ref       : (1,  D)       linear_out.bias               (f32, shared)
    out_ref         : (Bt, Lq, D)
    attn_ref        : (Bt, Lq, Lk)
    """
    Bt, Lq, D = dec_ref.shape
    _, Lk, E2 = ctx_ref.shape

    q_bf = dec_ref[...].astype(jnp.bfloat16)           # (Bt, Lq, D)
    c_f32 = ctx_ref[...]                                # (Bt, Lk, E2) f32
    c_bf = c_f32.astype(jnp.bfloat16)

    # linear_in (no bias), flattened across the batch tile:
    #   (Bt*Lk, E2) @ (E2, D) -> f32                                            [MXU]
    c_in = jnp.dot(c_bf.reshape(Bt * Lk, E2), w_in_t_ref[...],
                   preferred_element_type=jnp.float32)
    c_in_bf = c_in.astype(jnp.bfloat16).reshape(Bt, Lk, D)

    # attention scores: output @ context_in^T per example -> (Bt, Lq, Lk)       [MXU]
    scores = jnp.einsum('bqd,bkd->bqk', q_bf, c_in_bf,
                        preferred_element_type=jnp.float32)

    # masked_fill of padded encoder positions; mask rebuilt in-kernel from lengths.
    base = pl.program_id(0) * Bt
    col = lax.broadcasted_iota(jnp.int32, (Lq, Lk), 1)
    masked = [jnp.where(col >= lens_ref[base + i], _MASK_FILL, scores[i])[None]
              for i in range(Bt)]
    scores = jnp.concatenate(masked, axis=0)            # (Bt, Lq, Lk) f32

    # numerically stable softmax over Lk, kept in f32 (VPU / EUP / XLU).
    row_max = jnp.max(scores, axis=-1, keepdims=True)
    p = jnp.exp(scores - row_max)
    inv = pl.reciprocal(jnp.sum(p, axis=-1, keepdims=True), approx=True)
    attn = p * inv
    attn_ref[...] = attn.astype(attn_ref.dtype)

    # weighted context: attn @ context per example -> (Bt, Lq, E2)              [MXU]
    ctx_vec = jnp.einsum('bqk,bke->bqe', attn.astype(jnp.bfloat16), c_bf,
                         preferred_element_type=jnp.float32)

    # linear_out on cat([ctx_vec, output], -1) WITHOUT materializing the concat:
    #   cat @ W_out.T == ctx_vec @ W_out[:, :E2].T + output @ W_out[:, E2:].T
    # Both GEMMs flattened across the batch tile (weights are batch-shared).    [MXU]
    h = (jnp.dot(ctx_vec.astype(jnp.bfloat16).reshape(Bt * Lq, E2),
                 w_out_ctx_t_ref[...], preferred_element_type=jnp.float32)
         + jnp.dot(q_bf.reshape(Bt * Lq, D), w_out_dec_t_ref[...],
                   preferred_element_type=jnp.float32)
         + b_out_ref[...])
    out_ref[...] = jnp.tanh(h).reshape(Bt, Lq, D).astype(out_ref.dtype)


def _pick_batch_tile(B, Lq, Lk, D, E2):
    """Largest divisor of B whose per-step working set stays well inside scoped VMEM
    (conservative for v7x), stopping once the flattened GEMMs reach >=256 rows."""
    target_rows = 256                      # fills the 256-wide MXU (128 already ok on v5e)
    vmem_budget = 8 * 1024 * 1024
    best = 1
    for bt in range(1, B + 1):
        if B % bt:
            continue
        per_step = 4 * bt * (2 * Lq * D + Lk * E2 + 2 * Lq * Lk + Lq * E2 + Lk * D)
        if bt > 1 and 2 * per_step > vmem_budget:
            break
        best = bt
        if bt * min(Lq, Lk) >= target_rows:
            break
    return best


def attention_forward(output, context, src_lens, w_in, w_out, b_out, *, batch_tile=None):
    """output: (B, Lq, D) f32, context: (B, Lk, E2) f32, src_lens: (B,) int32 valid
    encoder lengths (mask[b, q, k] = k >= src_lens[b]), w_in: (D, E2),
    w_out: (D, E2 + D), b_out: (D,).  Returns (out, attn) like the PyTorch module."""
    B, Lq, D = output.shape
    _, Lk, E2 = context.shape

    Bt = _pick_batch_tile(B, Lq, Lk, D, E2) if batch_tile is None else batch_tile
    assert B % Bt == 0, (B, Bt)

    # Tiny one-time weight prep (bf16 -> one-pass MXU matmuls; bias stays f32).
    # No transposes / copies of the big activation tensors.
    w_in_t = jnp.asarray(w_in, jnp.float32).T.astype(jnp.bfloat16)       # (E2, D)
    w_out_f = jnp.asarray(w_out, jnp.float32)
    w_out_ctx_t = w_out_f[:, :E2].T.astype(jnp.bfloat16)                 # (E2, D)
    w_out_dec_t = w_out_f[:, E2:].T.astype(jnp.bfloat16)                 # (D, D)
    b2 = jnp.asarray(b_out, jnp.float32).reshape(1, D)
    lens = jnp.asarray(src_lens, jnp.int32)

    flops = 2 * B * (Lk * E2 * D + Lq * Lk * D + Lq * Lk * E2 + Lq * D * (E2 + D))
    transcendentals = B * Lq * (Lk + D + 1)              # exp + tanh + reciprocal
    bytes_accessed = (4 * B * (2 * Lq * D + Lk * E2 + Lq * Lk)
                      + 2 * (2 * E2 * D + D * D) + 4 * D + 4 * B)

    return pl.pallas_call(
        attention_kernel,
        out_shape=(jax.ShapeDtypeStruct((B, Lq, D), output.dtype),
                   jax.ShapeDtypeStruct((B, Lq, Lk), jnp.float32)),
        grid_spec=pltpu.PrefetchScalarGridSpec(
            num_scalar_prefetch=1,
            grid=(B // Bt,),
            in_specs=[
                pl.BlockSpec((Bt, Lq, D), lambda g, ls: (g, 0, 0)),    # decoder output
                pl.BlockSpec((Bt, Lk, E2), lambda g, ls: (g, 0, 0)),   # encoder context
                pl.BlockSpec((E2, D), lambda g, ls: (0, 0)),           # linear_in.weight.T
                pl.BlockSpec((E2, D), lambda g, ls: (0, 0)),           # linear_out ctx half
                pl.BlockSpec((D, D), lambda g, ls: (0, 0)),            # linear_out dec half
                pl.BlockSpec((1, D), lambda g, ls: (0, 0)),            # linear_out bias
            ],
            out_specs=[
                pl.BlockSpec((Bt, Lq, D), lambda g, ls: (g, 0, 0)),
                pl.BlockSpec((Bt, Lq, Lk), lambda g, ls: (g, 0, 0)),
            ],
        ),
        compiler_params=pltpu.CompilerParams(
            dimension_semantics=("parallel",),           # batch tiles shard across TCs (v7x)
            vmem_limit_bytes=32 * 1024 * 1024,
        ),
        cost_estimate=pl.CostEstimate(flops=flops, transcendentals=transcendentals,
                                      bytes_accessed=bytes_accessed),
    )(lens, output, context, w_in_t, w_out_ctx_t, w_out_dec_t, b2)


def attention_reference(output, context, mask, w_in, w_out, b_out, *, bf16_matmuls=True):
    """Pure-JAX reference of the module's forward pass.  With bf16_matmuls=True the
    matmul operands are rounded to bf16 and accumulated in f32, matching the kernel's
    MXU precision policy so the self-test can use a tight tolerance."""
    E2 = context.shape[-1]
    if bf16_matmuls:
        cast, prec = (lambda x: x.astype(jnp.bfloat16)), None
    else:
        cast, prec = (lambda x: x.astype(jnp.float32)), lax.Precision.HIGHEST
    w_in_f = jnp.asarray(w_in, jnp.float32)
    w_out_f = jnp.asarray(w_out, jnp.float32)

    context_in = jnp.einsum('bke,de->bkd', cast(context), cast(w_in_f),
                            preferred_element_type=jnp.float32, precision=prec)
    attn = jnp.einsum('bqd,bkd->bqk', cast(output), cast(context_in),
                      preferred_element_type=jnp.float32, precision=prec)
    attn = jnp.where(mask, _MASK_FILL, attn)
    attn = jax.nn.softmax(attn, axis=2)
    ctx = jnp.einsum('bqk,bke->bqe', cast(attn), cast(context),
                     preferred_element_type=jnp.float32, precision=prec)
    cat = jnp.concatenate([ctx, output], axis=2)
    out = jnp.tanh(jnp.einsum('bqc,dc->bqd', cast(cat), cast(w_out_f),
                              preferred_element_type=jnp.float32, precision=prec)
                   + jnp.asarray(b_out, jnp.float32))
    return out, attn


if __name__ == "__main__":
    # Small shapes implied by the module: enc_hidden=32 (E2=64), dec_hidden=32 (D=32).
    B, Lq, Lk = 2, 8, 16
    enc_hidden, dec_hidden = 32, 32
    E2, D = 2 * enc_hidden, dec_hidden

    key = jax.random.PRNGKey(0)
    k_out, k_ctx, k_win, k_wout, k_bout = jax.random.split(key, 5)

    output = jax.random.normal(k_out, (B, Lq, D), dtype=jnp.float32)
    context = jax.random.normal(k_ctx, (B, Lk, E2), dtype=jnp.float32)

    # Encoder-padding mask parameterized by per-example source lengths.
    src_lens = jnp.array([Lk, Lk - 5], dtype=jnp.int32)
    mask = jnp.broadcast_to(
        jnp.arange(Lk)[None, None, :] >= src_lens[:, None, None], (B, Lq, Lk))

    # nn.Linear-style parameters.
    bound_in = 1.0 / (E2 ** 0.5)
    w_in = jax.random.uniform(k_win, (D, E2), minval=-bound_in, maxval=bound_in,
                              dtype=jnp.float32)
    bound_out = 1.0 / ((E2 + D) ** 0.5)
    w_out = jax.random.uniform(k_wout, (D, E2 + D), minval=-bound_out,
                               maxval=bound_out, dtype=jnp.float32)
    b_out = jax.random.uniform(k_bout, (D,), minval=-bound_out, maxval=bound_out,
                               dtype=jnp.float32)

    out, attn = attention_forward(output, context, src_lens, w_in, w_out, b_out)
    out, attn = jax.block_until_ready((out, attn))

    # Precision-matched reference (bf16 MXU operands, f32 accumulation/softmax).
    out_ref, attn_ref = attention_reference(output, context, mask, w_in, w_out, b_out,
                                            bf16_matmuls=True)
    assert out.shape == (B, Lq, D) and attn.shape == (B, Lq, Lk)
    # Tolerance covers f32 accumulation-order differences and the approximate (EUP)
    # reciprocal used for the softmax denominator.
    assert jnp.allclose(out, out_ref, atol=5e-3, rtol=5e-3), \
        float(jnp.max(jnp.abs(out - out_ref)))
    assert jnp.allclose(attn, attn_ref, atol=5e-3, rtol=5e-3), \
        float(jnp.max(jnp.abs(attn - attn_ref)))

    print("KERNEL_OK")
</pallas_src>

<mosaic_0001>
module attributes {stable_mosaic.version = 11 : i64} {
  func.func @attention_kernel(%arg0: i32, %arg1: memref<2xi32, #tpu.memory_space<smem>>, %arg2: memref<2x8x32xf32, #tpu.memory_space<vmem>>, %arg3: memref<2x16x64xf32, #tpu.memory_space<vmem>>, %arg4: memref<64x32xbf16, #tpu.memory_space<vmem>>, %arg5: memref<64x32xbf16, #tpu.memory_space<vmem>>, %arg6: memref<32x32xbf16, #tpu.memory_space<vmem>>, %arg7: memref<1x32xf32, #tpu.memory_space<vmem>>, %arg8: memref<2x8x32xf32, #tpu.memory_space<vmem>>, %arg9: memref<2x8x16xf32, #tpu.memory_space<vmem>>) attributes {dimension_semantics = [#tpu.dimension_semantics<parallel>], iteration_bounds = array<i64: 1>, scalar_prefetch = 1 : i64, scratch_operands = 0 : i64, tpu.core_type = #tpu.core_type<tc>, window_params = [{transform_indices = @transform_0, window_bounds = array<i64: 2, 8, 32>}, {transform_indices = @transform_1, window_bounds = array<i64: 2, 16, 64>}, {pipeline_mode = #tpu.pipeline_mode<synchronous>, transform_indices = @transform_2, window_bounds = array<i64: 64, 32>}, {pipeline_mode = #tpu.pipeline_mode<synchronous>, transform_indices = @transform_3, window_bounds = array<i64: 64, 32>}, {pipeline_mode = #tpu.pipeline_mode<synchronous>, transform_indices = @transform_4, window_bounds = array<i64: 32, 32>}, {pipeline_mode = #tpu.pipeline_mode<synchronous>, transform_indices = @transform_5, window_bounds = array<i64: 1, 32>}, {transform_indices = @transform_6, window_bounds = array<i64: 2, 8, 32>}, {transform_indices = @transform_7, window_bounds = array<i64: 2, 8, 16>}]} {
    %c0 = arith.constant 0 : index
    %c0_0 = arith.constant 0 : index
    %c0_1 = arith.constant 0 : index
    %0 = vector.load %arg2[%c0, %c0_0, %c0_1] : memref<2x8x32xf32, #tpu.memory_space<vmem>>, vector<2x8x32xf32>
    %1 = arith.truncf %0 : vector<2x8x32xf32> to vector<2x8x32xbf16>
    %c0_2 = arith.constant 0 : index
    %c0_3 = arith.constant 0 : index
    %c0_4 = arith.constant 0 : index
    %2 = vector.load %arg3[%c0_2, %c0_3, %c0_4] : memref<2x16x64xf32, #tpu.memory_space<vmem>>, vector<2x16x64xf32>
    %3 = arith.truncf %2 : vector<2x16x64xf32> to vector<2x16x64xbf16>
    %4 = vector.shape_cast %3 : vector<2x16x64xbf16> to vector<32x64xbf16>
    %c0_5 = arith.constant 0 : index
    %c0_6 = arith.constant 0 : index
    %5 = vector.load %arg4[%c0_5, %c0_6] : memref<64x32xbf16, #tpu.memory_space<vmem>>, vector<64x32xbf16>
    %cst = arith.constant dense<0.000000e+00> : vector<32x32xf32>
    %6 = tpu.matmul %4, %5, %cst {dimension_numbers = #tpu.dot_dimension_numbers<[1], [0], [0], [1], [0, 0, 1, 1], [], []>} : vector<32x64xbf16>, vector<64x32xbf16>, vector<32x32xf32> -> vector<32x32xf32>
    %7 = arith.truncf %6 : vector<32x32xf32> to vector<32x32xbf16>
    %8 = vector.shape_cast %7 : vector<32x32xbf16> to vector<2x16x32xbf16>
    "tpu.trace_start"() <{level = 10 : i32, message = "bqd,bkd->bqk"}> : () -> ()
    %cst_7 = arith.constant dense<0.000000e+00> : vector<2x8x16xf32>
    %9 = tpu.matmul %1, %8, %cst_7 {dimension_numbers = #tpu.dot_dimension_numbers<[2], [2], [1], [1], [0, 0, 0, 1, 1, 1], [0], [0]>} : vector<2x8x32xbf16>, vector<2x16x32xbf16>, vector<2x8x16xf32> -> vector<2x8x16xf32>
    "tpu.trace_stop"() : () -> ()
    %c2_i32 = arith.constant 2 : i32
    %10 = arith.muli %arg0, %c2_i32 : i32
    %11 = tpu.iota {dimensions = array<i32: 1>} : vector<8x16xi32>
    %c0_i32 = arith.constant 0 : i32
    %12 = arith.addi %10, %c0_i32 : i32
    %13 = arith.index_cast %12 : i32 to index
    %14 = memref.load %arg1[%13] : memref<2xi32, #tpu.memory_space<smem>>
    %15 = vector.broadcast %14 : i32 to vector<8x16xi32>
    %16 = arith.cmpi sge, %11, %15 : vector<8x16xi32>
    %17 = vector.extract_strided_slice %9 {offsets = [0, 0, 0], sizes = [1, 8, 16], strides = [1, 1, 1]} : vector<2x8x16xf32> to vector<1x8x16xf32>
    %18 = vector.shape_cast %17 : vector<1x8x16xf32> to vector<8x16xf32>
    %cst_8 = arith.constant -1.000000e+06 : f32
    %19 = vector.broadcast %cst_8 : f32 to vector<8x16xf32>
    %20 = arith.select %16, %19, %18 : vector<8x16xi1>, vector<8x16xf32>
    %21 = vector.shape_cast %20 : vector<8x16xf32> to vector<1x8x16xf32>
    %c1_i32 = arith.constant 1 : i32
    %22 = arith.addi %10, %c1_i32 : i32
    %23 = arith.index_cast %22 : i32 to index
    %24 = memref.load %arg1[%23] : memref<2xi32, #tpu.memory_space<smem>>
    %25 = vector.broadcast %24 : i32 to vector<8x16xi32>
    %26 = arith.cmpi sge, %11, %25 : vector<8x16xi32>
    %27 = vector.extract_strided_slice %9 {offsets = [1, 0, 0], sizes = [1, 8, 16], strides = [1, 1, 1]} : vector<2x8x16xf32> to vector<1x8x16xf32>
    %28 = vector.shape_cast %27 : vector<1x8x16xf32> to vector<8x16xf32>
    %cst_9 = arith.constant -1.000000e+06 : f32
    %29 = vector.broadcast %cst_9 : f32 to vector<8x16xf32>
    %30 = arith.select %26, %29, %28 : vector<8x16xi1>, vector<8x16xf32>
    %31 = vector.shape_cast %30 : vector<8x16xf32> to vector<1x8x16xf32>
    %32 = tpu.concatenate %21, %31 in 0 : vector<1x8x16xf32>, vector<1x8x16xf32> -> vector<2x8x16xf32>
    %cst_10 = arith.constant dense<0xFF800000> : vector<2x8xf32>
    %33 = vector.multi_reduction <maximumf>, %32, %cst_10 [2] : vector<2x8x16xf32> to vector<2x8xf32>
    %34 = vector.shape_cast %33 : vector<2x8xf32> to vector<2x8x1xf32>
    %35 = vector.broadcast %34 : vector<2x8x1xf32> to vector<2x8x16xf32>
    %36 = arith.subf %32, %35 : vector<2x8x16xf32>
    %37 = math.exp %36 : vector<2x8x16xf32>
    %cst_11 = arith.constant dense<0.000000e+00> : vector<2x8xf32>
    %38 = vector.multi_reduction <add>, %37, %cst_11 [2] : vector<2x8x16xf32> to vector<2x8xf32>
    %39 = vector.shape_cast %38 : vector<2x8xf32> to vector<2x8x1xf32>
    %40 = tpu.reciprocal %39 {approx = true} : vector<2x8x1xf32> -> vector<2x8x1xf32>
    %41 = vector.broadcast %40 : vector<2x8x1xf32> to vector<2x8x16xf32>
    %42 = arith.mulf %37, %41 : vector<2x8x16xf32>
    %c0_12 = arith.constant 0 : index
    %c0_13 = arith.constant 0 : index
    %c0_14 = arith.constant 0 : index
    %43 = vector.load %arg9[%c0_12, %c0_13, %c0_14] : memref<2x8x16xf32, #tpu.memory_space<vmem>>, vector<2x8x16xf32>
    tpu.vector_store %arg9[%c0_12, %c0_13, %c0_14], %42 {strides = array<i32>} : memref<2x8x16xf32, #tpu.memory_space<vmem>>, vector<2x8x16xf32>,
    %44 = arith.truncf %42 : vector<2x8x16xf32> to vector<2x8x16xbf16>
    "tpu.trace_start"() <{level = 10 : i32, message = "bqk,bke->bqe"}> : () -> ()
    %cst_15 = arith.constant dense<0.000000e+00> : vector<2x8x64xf32>
    %45 = tpu.matmul %44, %3, %cst_15 {dimension_numbers = #tpu.dot_dimension_numbers<[2], [1], [1], [2], [0, 0, 0, 1, 1, 2], [0], [0]>} : vector<2x8x16xbf16>, vector<2x16x64xbf16>, vector<2x8x64xf32> -> vector<2x8x64xf32>
    "tpu.trace_stop"() : () -> ()
    %46 = arith.truncf %45 : vector<2x8x64xf32> to vector<2x8x64xbf16>
    %47 = vector.shape_cast %46 : vector<2x8x64xbf16> to vector<16x64xbf16>
    %c0_16 = arith.constant 0 : index
    %c0_17 = arith.constant 0 : index
    %48 = vector.load %arg5[%c0_16, %c0_17] : memref<64x32xbf16, #tpu.memory_space<vmem>>, vector<64x32xbf16>
    %cst_18 = arith.constant dense<0.000000e+00> : vector<16x32xf32>
    %49 = tpu.matmul %47, %48, %cst_18 {dimension_numbers = #tpu.dot_dimension_numbers<[1], [0], [0], [1], [0, 0, 1, 1], [], []>} : vector<16x64xbf16>, vector<64x32xbf16>, vector<16x32xf32> -> vector<16x32xf32>
    %50 = vector.shape_cast %1 : vector<2x8x32xbf16> to vector<16x32xbf16>
    %c0_19 = arith.constant 0 : index
    %c0_20 = arith.constant 0 : index
    %51 = vector.load %arg6[%c0_19, %c0_20] : memref<32x32xbf16, #tpu.memory_space<vmem>>, vector<32x32xbf16>
    %cst_21 = arith.constant dense<0.000000e+00> : vector<16x32xf32>
    %52 = tpu.matmul %50, %51, %cst_21 {dimension_numbers = #tpu.dot_dimension_numbers<[1], [0], [0], [1], [0, 0, 1, 1], [], []>} : vector<16x32xbf16>, vector<32x32xbf16>, vector<16x32xf32> -> vector<16x32xf32>
    %53 = arith.addf %49, %52 : vector<16x32xf32>
    %c0_22 = arith.constant 0 : index
    %c0_23 = arith.constant 0 : index
    %54 = vector.load %arg7[%c0_22, %c0_23] : memref<1x32xf32, #tpu.memory_space<vmem>>, vector<1x32xf32>
    %55 = vector.broadcast %54 : vector<1x32xf32> to vector<16x32xf32>
    %56 = arith.addf %53, %55 : vector<16x32xf32>
    %57 = math.tanh %56 : vector<16x32xf32>
    %58 = vector.shape_cast %57 : vector<16x32xf32> to vector<2x8x32xf32>
    %c0_24 = arith.constant 0 : index
    %c0_25 = arith.constant 0 : index
    %c0_26 = arith.constant 0 : index
    %59 = vector.load %arg8[%c0_24, %c0_25, %c0_26] : memref<2x8x32xf32, #tpu.memory_space<vmem>>, vector<2x8x32xf32>
    tpu.vector_store %arg8[%c0_24, %c0_25, %c0_26], %58 {strides = array<i32>} : memref<2x8x32xf32, #tpu.memory_space<vmem>>, vector<2x8x32xf32>,
    return
  }
  func.func @transform_0(%arg0: i32, %arg1: memref<2xi32, #tpu.memory_space<smem>>) -> (i32, i32, i32) {
    %c0_i32 = arith.constant 0 : i32
    %c0_i32_0 = arith.constant 0 : i32
    %c0_i32_1 = arith.constant 0 : i32
    return %arg0, %c0_i32, %c0_i32_0 : i32, i32, i32
  }
  func.func @transform_1(%arg0: i32, %arg1: memref<2xi32, #tpu.memory_space<smem>>) -> (i32, i32, i32) {
    %c0_i32 = arith.constant 0 : i32
    %c0_i32_0 = arith.constant 0 : i32
    %c0_i32_1 = arith.constant 0 : i32
    return %arg0, %c0_i32, %c0_i32_0 : i32, i32, i32
  }
  func.func @transform_2(%arg0: i32, %arg1: memref<2xi32, #tpu.memory_space<smem>>) -> (i32, i32) {
    %c0_i32 = arith.constant 0 : i32
    %c0_i32_0 = arith.constant 0 : i32
    %c0_i32_1 = arith.constant 0 : i32
    return %c0_i32, %c0_i32_0 : i32, i32
  }
  func.func @transform_3(%arg0: i32, %arg1: memref<2xi32, #tpu.memory_space<smem>>) -> (i32, i32) {
    %c0_i32 = arith.constant 0 : i32
    %c0_i32_0 = arith.constant 0 : i32
    %c0_i32_1 = arith.constant 0 : i32
    return %c0_i32, %c0_i32_0 : i32, i32
  }
  func.func @transform_4(%arg0: i32, %arg1: memref<2xi32, #tpu.memory_space<smem>>) -> (i32, i32) {
    %c0_i32 = arith.constant 0 : i32
    %c0_i32_0 = arith.constant 0 : i32
    %c0_i32_1 = arith.constant 0 : i32
    return %c0_i32, %c0_i32_0 : i32, i32
  }
  func.func @transform_5(%arg0: i32, %arg1: memref<2xi32, #tpu.memory_space<smem>>) -> (i32, i32) {
    %c0_i32 = arith.constant 0 : i32
    %c0_i32_0 = arith.constant 0 : i32
    %c0_i32_1 = arith.constant 0 : i32
    return %c0_i32, %c0_i32_0 : i32, i32
  }
  func.func @transform_6(%arg0: i32, %arg1: memref<2xi32, #tpu.memory_space<smem>>) -> (i32, i32, i32) {
    %c0_i32 = arith.constant 0 : i32
    %c0_i32_0 = arith.constant 0 : i32
    %c0_i32_1 = arith.constant 0 : i32
    return %arg0, %c0_i32, %c0_i32_0 : i32, i32, i32
  }
  func.func @transform_7(%arg0: i32, %arg1: memref<2xi32, #tpu.memory_space<smem>>) -> (i32, i32, i32) {
    %c0_i32 = arith.constant 0 : i32
    %c0_i32_0 = arith.constant 0 : i32
    %c0_i32_1 = arith.constant 0 : i32
    return %arg0, %c0_i32, %c0_i32_0 : i32, i32, i32
  }
}

</mosaic_0001>

<bundles_post_ra>
// kernel: tpu_custom_call.1
= control target key start
LH: loop header
LB: loop body
LE: loop exit
PB: predicated region body
PF: predicated region fallthrough
CT: control target
= control target key end

     0   :  { %s928_s0 = inlined_call_operand.vmem [shape: s32[2], index: 0, kind: input, shape index: {}]   ;;  %s929_s1 = inlined_call_operand.vmem [shape: f32[2,8,32], index: 1, kind: input, shape index: {}]   ;;  %s930_s2 = inlined_call_operand.vmem [shape: f32[2,16,64], index: 2, kind: input, shape index: {}]   ;;  %s931_s3 = inlined_call_operand.vmem [shape: bf16[64,32], index: 3, kind: input, shape index: {}]   ;;  %s932_s4 = inlined_call_operand.vmem [shape: bf16[64,32], index: 4, kind: input, shape index: {}]   ;;  %s933_s5 = inlined_call_operand.vmem [shape: bf16[32,32], index: 5, kind: input, shape index: {}]   ;;  %s934_s6 = inlined_call_operand.vmem [shape: f32[1,32], index: 6, kind: input, shape index: {}]   ;;  %s935_s7 = inlined_call_operand.hbm [shape: f32[2,8,32], index: 7, kind: output, shape index: {0}]   ;;  %s936_s8 = inlined_call_operand.hbm [shape: f32[2,8,16], index: 8, kind: output, shape index: {1}]  }
   0x1   :  { %s14_s29 = sshll.u32 %s928_s0, 4  ;;  %s15_s29 = int_to_ptr.vmem [resolvable:$true] %s14_s29 }
   0x2   :  { %s677_s30 = scalar_lea.vmem %s15_s29, 16  ;;  %p682_p1 = scmp.lt.s32.totalorder %s15_s29, %s15_s29 }
   0x3   :  { %p678_p0 = scmp.ne.s32.totalorder %s15_s29, %s677_s30  ;;  %p683_p2 = scmp.lt.s32.totalorder %s677_s30, %s677_s30 }
   0x5   :  { %p684_p3 = por %p683_p2, %p682_p1 }
   0x7   :  { %p685_p4 = pnand %p684_p3, %p678_p0 }
   0x9   :  { %688 = shalt.err (!%p685_p4)  }
   0xa   :  { %s739_s9 = smov [#allocation3]  }
   0xb   :  { %17 = dma.vmem_to_smem %s15_s29, 16, %s739_s9, [#allocation2] }
   0xc   :  { %733 = dma.done.wait [#allocation2], 16 }
   0xd   :  { %734 = vsyncadd [#allocation2], 4294967280 }
   0xe   :  { %19 = sfence }
   0xf   :  { %20 = vsyncpa [#allocation5], 0  ;;  %v655_v0 = vld [vmem:[%s931_s3] sm:$0xff]   ;;  %v656_v1 = vld [vmem:[%s931_s3 + $0x8] sm:$0xff]   ;;  %vm77_vm0 = vcmask 523264  }
  0x10   :  { %592 = vmatprep.subr.bf16.mxu0 %v655_v0  ;;  %v657_v2 = vld [vmem:[%s931_s3 + $0x10] sm:$0xff]   ;;  %v39_v3 = vld [vmem:[%s930_s2] sm:$0xff]  ;;  %v40_v4 = vld [vmem:[%s930_s2 + $0x8] sm:$0xff] }
  0x11   :  { %593 = vmatpush3.bf16.msra.mxu0 %v655_v0  ;;  %v43_v5 = vpack.c.bf16 %v40_v4, %v39_v3  ;;  %v658_v6 = vld [vmem:[%s931_s3 + $0x18] sm:$0xff]  }
  0x12   :  { %594 = vmatprep.subr.bf16.mxu0 %v656_v1 }
  0x13   :  { %600 = vmatprep.mubr.msk.bf16.mxu0 %vm77_vm0, %v43_v5 }
  0x15   :  { %595 = vmatpush3.bf16.msra.mxu0 %v656_v1 }
  0x16   :  { %596 = vmatprep.subr.bf16.mxu0 %v657_v2 }
  0x17   :  { %21 = vsyncpa [#allocation7], 0  ;;  %v41_v7 = vld [vmem:[%s930_s2 + $0x10] sm:$0xff]  ;;  %v42_v8 = vld [vmem:[%s930_s2 + $0x18] sm:$0xff]  ;;  %v740_v10 = vmov 0.0   ;;  %vm741_vm1 = vmmov 0   ;;  %v229_v24 = vlaneseq }
  0x18   :  { %v44_v9 = vpack.c.bf16 %v42_v8, %v41_v7  ;;  %604 = vmatprep.subr.bf16.mxu1 %v740_v10  ;;  %606 = vmatprep.mubr.msk.bf16.mxu1 %vm741_vm1, %v740_v10  ;;  %v830_v11 = vld [vmem:[%s929_s1] sm:$0xff]  ;;  %v835_v12 = vld [vmem:[%s929_s1 + $0x8] sm:$0xff]  ;;  %vm135_vm2 = vcmask 261120   ;;  %s231_s1 = sld [smem:[#allocation3]]  ;;  %s554_s27 = sld [smem:[#allocation3 + $0x1]]  ;;  %vm240_vm4 = vcmask 130048  }
  0x19   :  { %597 = vmatpush3.bf16.msra.mxu0 %v657_v2  ;;  %v568_v13 = vpack.c.bf16 %v835_v12, %v830_v11  ;;  %v37_v21 = vpack.c.bf16 %v830_v11, %v830_v11  ;;  %v38_v23 = vpack.c.bf16 %v835_v12, %v835_v12  ;;  %v230_v25 = vand.u32 127, %v229_v24  ;;  %v659_v57 = vld [vmem:[%s932_s4] sm:$0xff]   ;;  %v660_v59 = vld [vmem:[%s932_s4 + $0x8] sm:$0xff]   ;;  %v662_v61 = vld [vmem:[%s932_s4 + $0x10] sm:$0xff]  }
  0x1a   :  { %598 = vmatprep.subr.bf16.mxu0 %v658_v6  ;;  %v661_v60 = vld [vmem:[%s933_s5] sm:$0xff]   ;;  %v663_v62 = vld [vmem:[%s933_s5 + $0x8] sm:$0xff]   ;;  %v664_v63 = vld [vmem:[%s932_s4 + $0x18] sm:$0xff]   ;;  %s742_s4 = smov [#allocation6]  }
  0x1b   :  { %s531_s5 = sshll.u32 %s742_s4, 4  ;;  %s532_s5 = int_to_ptr.vmem [resolvable:$true] %s531_s5 }
  0x1c   :  { %s689_s17 = scalar_lea.vmem %s532_s5, 256  ;;  %p694_p6 = scmp.lt.s32.totalorder %s532_s5, %s532_s5 }
  0x1d   :  { %599 = vmatpush3.bf16.msra.mxu0 %v658_v6  ;;  %p690_p5 = scmp.ne.s32.totalorder %s532_s5, %s689_s17  ;;  %p695_p7 = scmp.lt.s32.totalorder %s689_s17, %s689_s17 }
  0x1e   :  { %616 = vmatprep.subr.bf16.mxu0 %v740_v10  ;;  %v232_v26 = vstv %s231_s1  ;;  %v237_v33 = vstv %s554_s27 }
  0x1f   :  { %vm233_vm3 = vcmp.ge.s32.totalorder %v230_v25, %v232_v26  ;;  %vm238_vm5 = vcmp.ge.s32.totalorder %v230_v25, %v237_v33  ;;  %p696_p8 = por %p695_p7, %p694_p6 }
  0x20   :  { %601 = vmatmul.mubr.msk.bf16.vlgmr.msra.gmra.mrb[0].mxu0 %vm77_vm0, %v44_v9 }
  0x21   :  { %617 = vmatpush3.bf16.msra.mxu0 %v43_v5  ;;  %618 = vmatprep.mubr.msk.bf16.mxu0 %vm741_vm1, %v740_v10  ;;  %p697_p9 = pnand %p696_p8, %p690_p5 }
  0x22   :  { %628 = vmatprep.subr.bf16.mxu0 %v740_v10 }
  0xf3   :  { %v602_v14 = vpop.f32.mrb[0].mxu0 }
  0xf4   :  { %v118_v15 = vpop.f32.mrb[1].mxu0 }
  0xf5   :  { %v603_v16 = vpop.f32.mrb[2].mxu0 }
  0xf6   :  { %v134_v17 = vpack.c.bf16 %v603_v16, %v602_v14  ;;  %v121_v18 = vpop.f32.mrb[3].mxu0 }
  0xf7   :  { %v133_v19 = vpack.c.bf16 %v121_v18, %v118_v15 }
  0xf8   :  { %v186_v22 = vsel %vm135_vm2, %v134_v17, 0 }
  0xf9   :  { %v140_v20 = vsel %vm135_vm2, %v133_v19, 0 }
  0xfa   :  { %605 = vmatpush3.bf16.xpose.msra.mxu1 %v140_v20 }
  0xfb   :  { %610 = vmatprep.subr.bf16.mxu1 %v740_v10 }
 0x101   :  { %607 = vmatmul.mubr.msk.bf16.vlgmr.msra.gmra.mrb[0].mxu1 %vm135_vm2, %v37_v21 }
 0x102   :  { %611 = vmatpush3.bf16.xpose.msra.mxu1 %v186_v22  ;;  %612 = vmatprep.mubr.msk.bf16.mxu1 %vm741_vm1, %v740_v10 }
 0x103   :  { %622 = vmatprep.subr.bf16.mxu1 %v740_v10 }
 0x109   :  { %613 = vmatmul.mubr.msk.bf16.vlgmr.msra.gmra.mrb[4].mxu1 %vm135_vm2, %v38_v23 }
 0x10a   :  { %623 = vmatpush3.bf16.msra.mxu1 %v44_v9  ;;  %624 = vmatprep.mubr.msk.bf16.mxu1 %vm741_vm1, %v740_v10 }
 0x10b   :  { %636 = vmatprep.subr.bf16.mxu1 %v740_v10 }
 0x1d4   :  { %v176_v27 = vpop.f32.mrb[0].mxu1 }
 0x1d5   :  { %v234_v28 = vsel %vm233_vm3, -1000000.0, %v176_v27  ;;  %v608_v29 = vpop.f32.mrb[1].mxu1 }
 0x1d6   :  { %v179_v30 = vpop.f32.mrb[2].mxu1  ;;  %v241_v31 = vsel %vm240_vm4, %v234_v28, -inf }
 0x1d7   :  { %242 = vmax.xlane.f32.xlu0 %v241_v31  ;;  %v609_v32 = vpop.f32.mrb[3].mxu1 }
 0x1dc   :  { %v222_v34 = vpop.f32.mrb[4].mxu1 }
 0x1dd   :  { %v239_v35 = vsel %vm238_vm5, -1000000.0, %v222_v34  ;;  %v614_v36 = vpop.f32.mrb[5].mxu1 }
 0x1de   :  { %v225_v37 = vpop.f32.mrb[6].mxu1  ;;  %v244_v38 = vsel %vm240_vm4, %v239_v35, -inf }
 0x1df   :  { %245 = vmax.xlane.f32.xlu0 %v244_v38  ;;  %v615_v39 = vpop.f32.mrb[7].mxu1 }
 0x264   :  { %v243_v40 = vpop.xlane.xlu0 %242 }
 0x265   :  { %v247_v41 = vsub.f32 %v234_v28, %v243_v40 }
 0x267   :  { %v249_v42 = vmul.f32 1.442695, %v247_v41 }
 0x269   :  { %665 = vpow2.f32 %v249_v42 }
 0x26c   :  { %v246_v43 = vpop.xlane.xlu0 %245 }
 0x26d   :  { %v248_v44 = vsub.f32 %v239_v35, %v246_v43 }
 0x26f   :  { %v251_v45 = vmul.f32 1.442695, %v248_v44 }
 0x271   :  { %667 = vpow2.f32 %v251_v45 }
 0x273   :  { %v666_v46 = vpop.eup %665 }
 0x274   :  { %v253_v47 = vsel %vm240_vm4, %v666_v46, 0.0 }
 0x275   :  { %254 = vadd.xlane.f32.xlu1 %v253_v47 }
 0x27b   :  { %v668_v48 = vpop.eup %667 }
 0x27c   :  { %v256_v49 = vsel %vm240_vm4, %v668_v48, 0.0 }
 0x27d   :  { %257 = vadd.xlane.f32.xlu1 %v256_v49 }
 0x302   :  { %v255_v50 = vpop.xlane.xlu1 %254 }
 0x303   :  { %669 = vrcp.f32 %v255_v50 }
 0x30a   :  { %v258_v51 = vpop.xlane.xlu1 %257 }
 0x30b   :  { %671 = vrcp.f32 %v258_v51 }
 0x30d   :  { %v670_v52 = vpop.eup %669 }
 0x30e   :  { %v261_v53 = vmul.f32 %v670_v52, %v666_v46 }
 0x310   :  { %263 = vst.msk [vmem:[#allocation6] sm:$0xff] %vm240_vm4, %v261_v53  ;;  %v265_v54 = vpack.c.bf16 %v261_v53, %v261_v53 }
 0x312   :  { %619 = vmatmul.mubr.msk.bf16.vlgmr.msra.gmra.mrb[4].mxu0 %vm240_vm4, %v265_v54 }
 0x313   :  { %632 = vmatprep.mubr.msk.bf16.mxu0 %vm741_vm1, %v740_v10  ;;  %629 = vmatpush3.bf16.msra.mxu0 %v661_v60 }
 0x314   :  { %630 = vmatprep.subr.bf16.mxu0 %v740_v10 }
 0x315   :  { %v672_v55 = vpop.eup %671 }
 0x316   :  { %v262_v56 = vmul.f32 %v672_v55, %v668_v48 }
 0x317   :  { %631 = vmatpush3.bf16.msra.mxu0 %v663_v62 }
 0x318   :  { %264 = vst.msk [vmem:[#allocation6 + $0x8] sm:$0xff] %vm240_vm4, %v262_v56  ;;  %v266_v58 = vpack.c.bf16 %v262_v56, %v262_v56 }
 0x31a   :  { %625 = vmatmul.mubr.msk.bf16.vlgmr.msra.gmra.mrb[8].mxu1 %vm240_vm4, %v266_v58  ;;  %633 = vmatmul.mubr.msk.bf16.vlgmr.msra.gmra.mrb[8].mxu0 %vm135_vm2, %v568_v13 }
 0x31b   :  { %637 = vmatpush3.bf16.msra.mxu1 %v659_v57  ;;  %644 = vmatprep.mubr.msk.bf16.mxu1 %vm741_vm1, %v740_v10 }
 0x31c   :  { %638 = vmatprep.subr.bf16.mxu1 %v740_v10 }
 0x31f   :  { %639 = vmatpush3.bf16.msra.mxu1 %v660_v59 }
 0x320   :  { %640 = vmatprep.subr.bf16.mxu1 %v740_v10 }
 0x323   :  { %641 = vmatpush3.bf16.msra.mxu1 %v662_v61 }
 0x324   :  { %642 = vmatprep.subr.bf16.mxu1 %v740_v10 }
 0x327   :  { %643 = vmatpush3.bf16.msra.mxu1 %v664_v63 }
 0x3e5   :  { %v304_v0 = vpop.f32.mrb[4].mxu0 }
 0x3e6   :  { %v620_v1 = vpop.f32.mrb[5].mxu0 }
 0x3e7   :  { %v307_v2 = vpop.f32.mrb[6].mxu0 }
 0x3e8   :  { %v621_v3 = vpop.f32.mrb[7].mxu0 }
 0x3ed   :  { %v347_v4 = vpop.f32.mrb[8].mxu1  ;;  %v421_v9 = vpop.f32.mrb[8].mxu0 }
 0x3ee   :  { %v569_v5 = vpack.c.bf16 %v347_v4, %v304_v0  ;;  %v626_v6 = vpop.f32.mrb[9].mxu1  ;;  %v634_v10 = vpop.f32.mrb[9].mxu0 }
 0x3ef   :  { %v350_v7 = vpop.f32.mrb[10].mxu1  ;;  %v424_v14 = vpop.f32.mrb[10].mxu0 }
 0x3f0   :  { %v627_v8 = vpop.f32.mrb[11].mxu1  ;;  %645 = vmatmul.mubr.msk.bf16.vlgmr.msra.gmra.mrb[12].mxu1 %vm77_vm0, %v569_v5  ;;  %v635_v15 = vpop.f32.mrb[11].mxu0 }
 0x3f1   :  { %700 = shalt.err (!%p697_p9)
}
 0x3f2   :  { %s701_s20 = scalar_lea.hbm %s936_s8, 256 }
 0x3f3   :  { %p702_p10 = scmp.ne.s32.totalorder %s936_s8, %s701_s20  ;;  %p705_p11 = scmp.lt.u32.totalorder %s701_s20, %s936_s8 }
 0x3f5   :  { %p707_p12 = pnand %p705_p11, %p702_p10 }
 0x3f7   :  { %710 = shalt.err (!%p707_p12)
}
 0x3f8   :  { %s743_s2 = smov 128   ;;  %s744_s3 = smov 8   ;;  %v567_v12 = vld [vmem:[%s934_s6] ss:$0 sm:$0xff] }
 0x3f9   :  { %537 = dma.vmem_to_hbm [thread:$0]  %s532_s5, 256, %s936_s8, [#allocation7], %s743_s2, %s743_s2, %s744_s3  }
 0x3fa   :  { %s745_s28 = smov [#allocation4]  }
 0x3fb   :  { %s519_s29 = sshll.u32 %s745_s28, 4  ;;  %s520_s29 = int_to_ptr.vmem [resolvable:$true] %s519_s29 }
 0x3fc   :  { %s711_s8 = scalar_lea.vmem %s520_s29, 256  ;;  %p716_p0 = scmp.lt.s32.totalorder %s520_s29, %s520_s29 }
 0x3fd   :  { %p712_p13 = scmp.ne.s32.totalorder %s520_s29, %s711_s8  ;;  %p717_p1 = scmp.lt.s32.totalorder %s711_s8, %s711_s8 }
 0x3ff   :  { %p718_p2 = por %p717_p1, %p716_p0 }
 0x401   :  { %p719_p3 = pnand %p718_p2, %p712_p13 }
 0x4c3   :  { %v494_v11 = vpop.f32.mrb[12].mxu1 }
 0x4c4   :  { %v495_v13 = vadd.f32 %v494_v11, %v421_v9  ;;  %v646_v16 = vpop.f32.mrb[13].mxu1 }
 0x4c5   :  { %v497_v17 = vpop.f32.mrb[14].mxu1 }
 0x4c6   :  { %v508_v18 = vadd.f32 %v567_v12, %v495_v13  ;;  %v498_v19 = vadd.f32 %v497_v17, %v424_v14  ;;  %v647_v20 = vpop.f32.mrb[15].mxu1 }
 0x4c8   :  { %673 = vtanh.f32 %v508_v18  ;;  %v509_v21 = vadd.f32 %v567_v12, %v498_v19 }
 0x4ca   :  { %675 = vtanh.f32 %v509_v21 }
 0x4d2   :  { %v674_v22 = vpop.eup %673 }
 0x4d3   :  { %512 = vst.msk [vmem:[#allocation4] sm:$0xff] %vm135_vm2, %v674_v22 }
 0x4d4   :  { %v676_v23 = vpop.eup %675 }
 0x4d5   :  { %513 = vst.msk [vmem:[#allocation4 + $0x8] sm:$0xff] %vm135_vm2, %v676_v23 }
 0x4d6   :  { %722 = shalt.err (!%p719_p3)
}
 0x4d7   :  { %s723_s9 = scalar_lea.hbm %s935_s7, 256 }
 0x4d8   :  { %p724_p4 = scmp.ne.s32.totalorder %s935_s7, %s723_s9  ;;  %p727_p5 = scmp.lt.u32.totalorder %s723_s9, %s935_s7 }
 0x4da   :  { %p729_p6 = pnand %p727_p5, %p724_p4 }
 0x4dc   :  { %732 = shalt.err (!%p729_p6)
}
 0x4dd   :  { %525 = dma.vmem_to_hbm [thread:$0]  %s520_s29, 256, %s935_s7, [#allocation5], %s743_s2, %s743_s2, %s744_s3  }
 0x4de   :  { %735 = dma.done.wait [#allocation5], 256  }
 0x4df   :  { %736 = vsyncadd [#allocation5], 4294967040 }
 0x4e0   :  { %737 = dma.done.wait [#allocation7], 256  }
 0x4e1   :  { %738 = vsyncadd [#allocation7], 4294967040 }
 0x4e2   :  { %544 = vsyncpa [#allocation5], 1 }
 0x4e3   :  { %545 = vsyncpa [#allocation7], 1 }

</bundles_post_ra>
